<compile_context>
chip_gen: v6e
topology: v6e:2x2x1
jax: 0.10.0
libtpu: 0.0.40
codegen_flags: <defaults>
</compile_context>

<pallas_src>
import jax
import jax.numpy as jnp
from jax.experimental import pallas as pl
from jax.experimental.pallas import tpu as pltpu


def _multi_task_loss_kernel(ls_ref, out_ref):
    # ls_ref: (2, n) f32 in VMEM; row 0 = per-task losses, row 1 = sigma.
    # out_ref: (1,) f32 in SMEM.
    losses = ls_ref[0:1, :]
    sigma = ls_ref[1:2, :]
    sig2 = sigma * sigma
    # losses / (2*sig2) -> losses * 0.5 * vrcp(sig2): rcp + log both hit the EUP.
    term = losses * (0.5 * pl.reciprocal(sig2, approx=True)) + jnp.log(sig2 + 1.0)
    out_ref[0] = jnp.sum(term)


def multi_task_loss(losses, sigma):
    """losses: (n,) f32, sigma: (n,) f32 -> scalar f32 total loss."""
    n = losses.shape[0]
    assert sigma.shape[0] == n
    # Single (2, n) input block: one HBM->VMEM DMA instead of two.
    stacked = jnp.stack(
        [losses.astype(jnp.float32), sigma.astype(jnp.float32)], axis=0
    )  # (2, n)

    out = pl.pallas_call(
        _multi_task_loss_kernel,
        out_shape=jax.ShapeDtypeStruct((1,), jnp.float32),
        in_specs=[pl.BlockSpec((2, n), lambda: (0, 0))],
        out_specs=pl.BlockSpec(memory_space=pltpu.MemorySpace.SMEM),
    )(stacked)
    return out[0]


def multi_task_loss_ref(losses, sigma):
    sig2 = sigma.astype(jnp.float32) ** 2
    return jnp.sum(losses.astype(jnp.float32) / (2.0 * sig2) + jnp.log(sig2 + 1.0))


if __name__ == "__main__":
    n_losses = 4

    # Deterministic parameter init, matching torch.ones(n_losses) / n_losses.
    sigma = jnp.ones((n_losses,), jnp.float32) / n_losses

    # Deterministic example per-task scalar losses, positive.
    key = jax.random.PRNGKey(0)
    losses = jax.random.uniform(key, (n_losses,), jnp.float32, minval=0.1, maxval=2.0)

    out = multi_task_loss(losses, sigma)
    out = jax.block_until_ready(out)

    ref = multi_task_loss_ref(losses, sigma)
    # Tolerance relaxed (1e-3) because pl.reciprocal(approx=True) uses the
    # hardware approximate reciprocal.
    assert jnp.allclose(out, ref, rtol=1e-3, atol=1e-3), (out, ref)

    print("KERNEL_OK")
</pallas_src>

<mosaic_0001>
module attributes {stable_mosaic.version = 11 : i64} {
  func.func @_multi_task_loss_kernel(%arg0: memref<2x4xf32, #tpu.memory_space<vmem>>, %arg1: memref<1xf32, #tpu.memory_space<smem>>) attributes {dimension_semantics = [], scalar_prefetch = 0 : i64, scratch_operands = 0 : i64, tpu.core_type = #tpu.core_type<tc>} {
    %c0 = arith.constant 0 : index
    %c0_0 = arith.constant 0 : index
    %0 = vector.load %arg0[%c0, %c0_0] : memref<2x4xf32, #tpu.memory_space<vmem>>, vector<1x4xf32>
    %c1 = arith.constant 1 : index
    %c0_1 = arith.constant 0 : index
    %1 = vector.load %arg0[%c1, %c0_1] : memref<2x4xf32, #tpu.memory_space<vmem>>, vector<1x4xf32>
    %2 = arith.mulf %1, %1 : vector<1x4xf32>
    %3 = tpu.reciprocal %2 {approx = true} : vector<1x4xf32> -> vector<1x4xf32>
    %cst = arith.constant 5.000000e-01 : f32
    %4 = vector.broadcast %cst : f32 to vector<1x4xf32>
    %5 = arith.mulf %4, %3 : vector<1x4xf32>
    %6 = arith.mulf %0, %5 : vector<1x4xf32>
    %cst_2 = arith.constant 1.000000e+00 : f32
    %7 = vector.broadcast %cst_2 : f32 to vector<1x4xf32>
    %8 = arith.addf %2, %7 : vector<1x4xf32>
    %9 = math.log %8 : vector<1x4xf32>
    %10 = arith.addf %6, %9 : vector<1x4xf32>
    %11 = vector.shape_cast %10 : vector<1x4xf32> to vector<1x1x4xf32>
    %cst_3 = arith.constant dense<0.000000e+00> : vector<1xf32>
    %12 = vector.multi_reduction <add>, %11, %cst_3 [1, 2] : vector<1x1x4xf32> to vector<1xf32>
    %13 = vector.shape_cast %12 : vector<1xf32> to vector<1x1x1xf32>
    %14 = vector.extract %13[0, 0, 0] : f32 from vector<1x1x1xf32>
    %c0_4 = arith.constant 0 : index
    %15 = memref.load %arg1[%c0_4] : memref<1xf32, #tpu.memory_space<smem>>
    memref.store %14, %arg1[%c0_4] : memref<1xf32, #tpu.memory_space<smem>>
    return
  }
}

</mosaic_0001>

<bundles_post_ra>
// kernel: tpu_custom_call.1
= control target key start
LH: loop header
LB: loop body
LE: loop exit
PB: predicated region body
PF: predicated region fallthrough
CT: control target
= control target key end

     0   :  { %6 = vsyncpa [#allocation3], 0  ;;  %s116_s0 = inlined_call_operand.hbm [shape: f32[2,4], index: 0, kind: input, shape index: {}]   ;;  %s117_s1 = inlined_call_operand.hbm [shape: f32[1], index: 1, kind: output, shape index: {}]  }
   0x1   :  { %7 = vsyncpa [#allocation4], 0  ;;  %s98_s6 = smov [#allocation2]  }
   0x2   :  { %s14_s7 = sshll.u32 %s98_s6, 4  ;;  %s15_s7 = int_to_ptr.vmem [resolvable:$true] %s14_s7 }
   0x3   :  { %s74_s8 = scalar_lea.vmem %s15_s7, 32  ;;  %p79_p1 = scmp.lt.s32.totalorder %s15_s7, %s15_s7 }
   0x4   :  { %p75_p0 = scmp.ne.s32.totalorder %s15_s7, %s74_s8  ;;  %p80_p2 = scmp.lt.s32.totalorder %s74_s8, %s74_s8 }
   0x6   :  { %p81_p3 = por %p80_p2, %p79_p1 }
   0x8   :  { %p82_p4 = pnand %p81_p3, %p75_p0 }
   0xa   :  { %85 = shalt.err (!%p82_p4)
}
   0xb   :  { %17 = dma.hbm_to_vmem [thread:$0]  %s116_s0, 32, %s15_s7, [#allocation3]  }
   0xc   :  { %94 = dma.done.wait [#allocation3], 32  }
   0xd   :  { %95 = vsyncadd [#allocation3], 4294967264  ;;  %v22_v0 = vld [vmem:[#allocation2 + $0x1] sm:$0x1]  ;;  %v21_v4 = vld [vmem:[#allocation2] sm:$0x1] }
   0xe   :  { %v23_v1 = vmul.f32 %v22_v0, %v22_v0  ;;  %vm31_vm0 = vcmask 24576   ;;  %s99_s11 = smov [#allocation5]  }
  0x10   :  { %62 = vrcp.f32 %v23_v1  ;;  %v27_v2 = vadd.f32 1.0, %v23_v1 }
  0x12   :  { %64 = vlog2.f32 %v27_v2 }
  0x1d   :  { %v63_v3 = vpop.eup %62 }
  0x1e   :  { %v25_v5 = vmul.f32 0.5, %v63_v3 }
  0x1f   :  { %v65_v6 = vpop.eup %64 }
  0x20   :  { %v26_v7 = vmul.f32 %v25_v5, %v21_v4  ;;  %v29_v8 = vmul.f32 0.6931472, %v65_v6 }
  0x22   :  { %v30_v9 = vadd.f32 %v29_v8, %v26_v7 }
  0x24   :  { %v32_v10 = vsel %vm31_vm0, %v30_v9, 0.0 }
  0x25   :  { %33 = vadd.xlane.f32.xlu0 %v32_v10 }
  0xae   :  { %v34_v11 = vpop.xlane.xlu0 %33 }
  0xaf   :  { %v35_v12 = vrot.slane %v34_v11, 4 }
  0xb1   :  { %v36_v13 = vadd.f32 %v35_v12, %v34_v11 }
  0xb3   :  { %v37_v14 = vrot.slane %v36_v13, 2 }
  0xb5   :  { %v38_v15 = vadd.f32 %v37_v14, %v36_v13 }
  0xb7   :  { %v39_v16 = vrot.slane %v38_v15, 1 }
  0xb9   :  { %v40_v17 = vadd.f32 %v39_v16, %v38_v15 }
  0xbb   :  { %58 = vpush %v40_v17 }
  0xec   :  { %s59_s0 = spop %58 }
  0xed   :  { %43 = sst [smem:[#allocation5]] %s59_s0 }
  0xee   :  { %51 = dma.smem_to_hbm %s99_s11, 16, %s117_s1, [#allocation4]  }
  0xef   :  { %96 = dma.done.wait [#allocation4], 16  }
  0xf0   :  { %97 = vsyncadd [#allocation4], 4294967280 }
  0xf1   :  { %55 = sfence }
  0xf2   :  { %56 = vsyncpa [#allocation3], 1 }
  0xf3   :  { %57 = vsyncpa [#allocation4], 1 }

</bundles_post_ra>
